<compile_context>
chip_gen: v7x
topology: tpu7x:2x2x1
jax: 0.10.0
libtpu: 0.0.40
codegen_flags: <defaults>
</compile_context>

<pallas_src>
import functools

import jax
import jax.numpy as jnp
from jax import lax
from jax.experimental import pallas as pl
from jax.experimental.pallas import tpu as pltpu


def _fair_loss_kernel(lamda_ref, logits_ref, targets_ref, loss_ref,
                      count_acc, nllsum_acc, total_acc, *, batch_size):
    pid = pl.program_id(0)

    @pl.when(pid == 0)
    def _init():
        count_acc[...] = jnp.zeros_like(count_acc)
        nllsum_acc[...] = jnp.zeros_like(nllsum_acc)
        total_acc[...] = jnp.zeros_like(total_acc)
        loss_ref[...] = jnp.zeros_like(loss_ref)

    logits = logits_ref[...].astype(jnp.float32)          # (TB, C) f32 compute
    tgt = targets_ref[...]                                # (TB, 1) int32
    tb, c = logits.shape

    # Valid-row mask (wrapper pads the batch up to a multiple of the tile).
    row_ids = pid * tb + lax.broadcasted_iota(jnp.int32, (tb, 1), 0)
    row_valid = row_ids < batch_size                      # (TB, 1) bool

    # Single bool mask reused for target-logit, per-class count, per-class NLL sum.
    class_ids = lax.broadcasted_iota(jnp.int32, (tb, c), 1)
    mask = (class_ids == tgt) & row_valid                 # (TB, C) bool

    # Numerically-stable per-row log-sum-exp and NLL.
    m = jnp.max(logits, axis=-1, keepdims=True)           # (TB, 1)
    lse = m + jnp.log(jnp.sum(jnp.exp(logits - m), axis=-1, keepdims=True))
    tgt_logit = jnp.sum(jnp.where(mask, logits, 0.0), axis=-1, keepdims=True)
    nll = lse - tgt_logit                                  # (TB, 1)

    # Accumulate: per-class sample count, per-class NLL sum, total NLL.
    count_acc[...] += jnp.sum(mask.astype(jnp.float32), axis=0, keepdims=True)
    nllsum_acc[...] += jnp.sum(jnp.where(mask, nll, 0.0), axis=0, keepdims=True)
    total_acc[...] += jnp.sum(jnp.where(row_valid, nll, 0.0), axis=0, keepdims=True)

    @pl.when(pid == pl.num_programs(0) - 1)
    def _finalize():
        lam = lamda_ref[...]                               # (1, 1)
        count = count_acc[...]                             # (1, C)
        present = count > 0.0
        per_class_mean = jnp.where(
            present, nllsum_acc[...] / jnp.where(present, count, 1.0), 0.0)
        n_present = jnp.sum(present.astype(jnp.float32), axis=-1, keepdims=True)
        loss2 = jnp.sum(per_class_mean, axis=-1, keepdims=True) / n_present
        loss1 = total_acc[...] / jnp.float32(batch_size)
        loss_ref[...] = (1.0 - lam) * loss1 + lam * loss2


def _choose_tile_b(batch, n_classes, itemsize):
    """Largest multiple-of-8 batch tile whose logits block stays well under the
    most conservative (v5e, 16 MiB) scoped-VMEM budget with double buffering."""
    tile_budget_bytes = 4 * 1024 * 1024                    # per logits buffer
    max_rows = max(8, tile_budget_bytes // max(1, n_classes * itemsize))
    tile = min(1024, max_rows, pl.cdiv(batch, 8) * 8)
    return max(8, (tile // 8) * 8)


def fair_loss(logits, targets, num_classes, lamda, *,
              storage_dtype=jnp.bfloat16, tile_b=None):
    """logits: (B, num_classes) float, targets: (B,) int. Returns scalar float32."""
    B, C = logits.shape
    assert C == num_classes, "num_classes must match logits.shape[1]"

    # bf16 storage in HBM (memory-bound kernel); f32 compute inside the kernel.
    if storage_dtype is not None and logits.dtype == jnp.float32:
        logits = logits.astype(storage_dtype)
    targets2d = targets.astype(jnp.int32).reshape(B, 1)
    lamda_arr = jnp.full((1, 1), lamda, dtype=jnp.float32)

    if tile_b is None:
        tile_b = _choose_tile_b(B, C, jnp.dtype(logits.dtype).itemsize)
    num_tiles = pl.cdiv(B, tile_b)
    b_pad = num_tiles * tile_b
    if b_pad != B:
        logits = jnp.pad(logits, ((0, b_pad - B), (0, 0)))
        targets2d = jnp.pad(targets2d, ((0, b_pad - B), (0, 0)))

    out = pl.pallas_call(
        functools.partial(_fair_loss_kernel, batch_size=B),
        out_shape=jax.ShapeDtypeStruct((1, 1), jnp.float32),
        grid=(num_tiles,),
        in_specs=[
            pl.BlockSpec((1, 1), lambda i: (0, 0)),         # lamda (resident)
            pl.BlockSpec((tile_b, C), lambda i: (i, 0)),    # logits batch tile
            pl.BlockSpec((tile_b, 1), lambda i: (i, 0)),    # targets batch tile
        ],
        out_specs=pl.BlockSpec((1, 1), lambda i: (0, 0)),   # scalar loss (resident)
        scratch_shapes=[
            pltpu.VMEM((1, C), jnp.float32),                # per-class count
            pltpu.VMEM((1, C), jnp.float32),                # per-class NLL sum
            pltpu.VMEM((1, 1), jnp.float32),                # total NLL
        ],
        compiler_params=pltpu.CompilerParams(
            dimension_semantics=("arbitrary",),             # batch axis is a reduction
            vmem_limit_bytes=64 * 1024 * 1024,
        ),
    )(lamda_arr, logits, targets2d)
    return out[0, 0]


def _fair_loss_ref(logits, targets, num_classes, lamda):
    """Pure-JAX reference mirroring the PyTorch semantics."""
    B = logits.shape[0]
    logits = logits.astype(jnp.float32)
    logp = jax.nn.log_softmax(logits, axis=-1)
    nll = -jnp.take_along_axis(logp, targets.reshape(B, 1).astype(jnp.int32),
                               axis=-1)[:, 0]
    loss1 = jnp.mean(nll)
    count = jnp.bincount(targets, length=num_classes).astype(jnp.float32)
    w = jnp.where(count > 0, 1.0 / count, 0.0) * (B / num_classes)
    sw = w[targets]
    loss2 = jnp.sum(sw * nll) / jnp.sum(sw)
    return (1.0 - lamda) * loss1 + lamda * loss2


if __name__ == "__main__":
    key = jax.random.PRNGKey(0)
    B, num_classes = 8, 16
    lamda = 0.3

    k1, k2 = jax.random.split(key)
    logits = jax.random.normal(k1, (B, num_classes), dtype=jnp.float32)
    targets = jax.random.randint(k2, (B,), 0, num_classes, dtype=jnp.int32)

    loss = fair_loss(logits, targets, num_classes, lamda)
    jax.block_until_ready(loss)

    # Reference on the same bf16-stored logits the kernel consumes.
    logits_q = logits.astype(jnp.bfloat16).astype(jnp.float32)
    ref = _fair_loss_ref(logits_q, targets, num_classes, lamda)
    assert jnp.allclose(loss, ref, rtol=1e-4, atol=1e-4), (loss, ref)

    # Secondary check: multi-tile grid with batch padding (B not a tile multiple).
    B2 = 20
    k3, k4 = jax.random.split(k2)
    logits2 = jax.random.normal(k3, (B2, num_classes), dtype=jnp.float32)
    targets2 = jax.random.randint(k4, (B2,), 0, num_classes, dtype=jnp.int32)
    loss_mt = fair_loss(logits2, targets2, num_classes, lamda, tile_b=8)
    jax.block_until_ready(loss_mt)
    ref_mt = _fair_loss_ref(logits2.astype(jnp.bfloat16).astype(jnp.float32),
                            targets2, num_classes, lamda)
    assert jnp.allclose(loss_mt, ref_mt, rtol=1e-4, atol=1e-4), (loss_mt, ref_mt)

    print("KERNEL_OK")
</pallas_src>

<mosaic_0001>
module attributes {stable_mosaic.version = 11 : i64} {
  func.func @_fair_loss_kernel(%arg0: i32, %arg1: memref<1x1xf32, #tpu.memory_space<vmem>>, %arg2: memref<8x16xbf16, #tpu.memory_space<vmem>>, %arg3: memref<8x1xi32, #tpu.memory_space<vmem>>, %arg4: memref<1x1xf32, #tpu.memory_space<vmem>>, %arg5: memref<1x16xf32, #tpu.memory_space<vmem>>, %arg6: memref<1x16xf32, #tpu.memory_space<vmem>>, %arg7: memref<1x1xf32, #tpu.memory_space<vmem>>) attributes {dimension_semantics = [#tpu.dimension_semantics<arbitrary>], iteration_bounds = array<i64: 1>, scalar_prefetch = 0 : i64, scratch_operands = 3 : i64, tpu.core_type = #tpu.core_type<tc>, window_params = [{pipeline_mode = #tpu.pipeline_mode<synchronous>, transform_indices = @transform_0, window_bounds = array<i64: 1, 1>}, {transform_indices = @transform_1, window_bounds = array<i64: 8, 16>}, {transform_indices = @transform_2, window_bounds = array<i64: 8, 1>}, {pipeline_mode = #tpu.pipeline_mode<synchronous>, transform_indices = @transform_3, window_bounds = array<i64: 1, 1>}]} {
    %c0_i32 = arith.constant 0 : i32
    %0 = arith.cmpi eq, %arg0, %c0_i32 : i32
    %1 = arith.extui %0 : i1 to i32
    %c0_i32_0 = arith.constant 0 : i32
    %2 = arith.cmpi ne, %1, %c0_i32_0 : i32
    scf.if %2 {
      %cst_27 = arith.constant 0.000000e+00 : f32
      %57 = vector.broadcast %cst_27 : f32 to vector<1x16xf32>
      %c0_28 = arith.constant 0 : index
      %c0_29 = arith.constant 0 : index
      %58 = vector.load %arg5[%c0_28, %c0_29] : memref<1x16xf32, #tpu.memory_space<vmem>>, vector<1x16xf32>
      tpu.vector_store %arg5[%c0_28, %c0_29], %57 {strides = array<i32>} : memref<1x16xf32, #tpu.memory_space<vmem>>, vector<1x16xf32>,
      %cst_30 = arith.constant 0.000000e+00 : f32
      %59 = vector.broadcast %cst_30 : f32 to vector<1x16xf32>
      %c0_31 = arith.constant 0 : index
      %c0_32 = arith.constant 0 : index
      %60 = vector.load %arg6[%c0_31, %c0_32] : memref<1x16xf32, #tpu.memory_space<vmem>>, vector<1x16xf32>
      tpu.vector_store %arg6[%c0_31, %c0_32], %59 {strides = array<i32>} : memref<1x16xf32, #tpu.memory_space<vmem>>, vector<1x16xf32>,
      %cst_33 = arith.constant 0.000000e+00 : f32
      %61 = vector.broadcast %cst_33 : f32 to vector<1x1xf32>
      %c0_34 = arith.constant 0 : index
      %c0_35 = arith.constant 0 : index
      %62 = vector.load %arg7[%c0_34, %c0_35] : memref<1x1xf32, #tpu.memory_space<vmem>>, vector<1x1xf32>
      tpu.vector_store %arg7[%c0_34, %c0_35], %61 {strides = array<i32>} : memref<1x1xf32, #tpu.memory_space<vmem>>, vector<1x1xf32>,
      %cst_36 = arith.constant 0.000000e+00 : f32
      %63 = vector.broadcast %cst_36 : f32 to vector<1x1xf32>
      %c0_37 = arith.constant 0 : index
      %c0_38 = arith.constant 0 : index
      %64 = vector.load %arg4[%c0_37, %c0_38] : memref<1x1xf32, #tpu.memory_space<vmem>>, vector<1x1xf32>
      tpu.vector_store %arg4[%c0_37, %c0_38], %63 {strides = array<i32>} : memref<1x1xf32, #tpu.memory_space<vmem>>, vector<1x1xf32>,
    } else {
    }
    %c0 = arith.constant 0 : index
    %c0_1 = arith.constant 0 : index
    %3 = vector.load %arg2[%c0, %c0_1] : memref<8x16xbf16, #tpu.memory_space<vmem>>, vector<8x16xbf16>
    %4 = arith.extf %3 : vector<8x16xbf16> to vector<8x16xf32>
    %c0_2 = arith.constant 0 : index
    %c0_3 = arith.constant 0 : index
    %5 = vector.load %arg3[%c0_2, %c0_3] : memref<8x1xi32, #tpu.memory_space<vmem>>, vector<8x1xi32>
    %c8_i32 = arith.constant 8 : i32
    %6 = arith.muli %arg0, %c8_i32 : i32
    %7 = tpu.iota {dimensions = array<i32: 0>} : vector<8x1xi32>
    %8 = vector.broadcast %6 : i32 to vector<8x1xi32>
    %9 = arith.addi %8, %7 : vector<8x1xi32>
    %c8_i32_4 = arith.constant 8 : i32
    %10 = vector.broadcast %c8_i32_4 : i32 to vector<8x1xi32>
    %11 = arith.cmpi slt, %9, %10 : vector<8x1xi32>
    %12 = tpu.iota {dimensions = array<i32: 1>} : vector<8x16xi32>
    %13 = vector.broadcast %5 : vector<8x1xi32> to vector<8x16xi32>
    %14 = arith.cmpi eq, %12, %13 : vector<8x16xi32>
    %15 = vector.broadcast %11 : vector<8x1xi1> to vector<8x16xi1>
    %16 = arith.andi %14, %15 : vector<8x16xi1>
    %cst = arith.constant dense<0xFF800000> : vector<8xf32>
    %17 = vector.multi_reduction <maximumf>, %4, %cst [1] : vector<8x16xf32> to vector<8xf32>
    %18 = vector.shape_cast %17 : vector<8xf32> to vector<8x1xf32>
    %19 = vector.broadcast %18 : vector<8x1xf32> to vector<8x16xf32>
    %20 = arith.subf %4, %19 : vector<8x16xf32>
    %21 = math.exp %20 : vector<8x16xf32>
    %cst_5 = arith.constant dense<0.000000e+00> : vector<8xf32>
    %22 = vector.multi_reduction <add>, %21, %cst_5 [1] : vector<8x16xf32> to vector<8xf32>
    %23 = vector.shape_cast %22 : vector<8xf32> to vector<8x1xf32>
    %24 = math.log %23 : vector<8x1xf32>
    %25 = arith.addf %18, %24 : vector<8x1xf32>
    %cst_6 = arith.constant 0.000000e+00 : f32
    %26 = vector.broadcast %cst_6 : f32 to vector<8x16xf32>
    %27 = arith.select %16, %4, %26 : vector<8x16xi1>, vector<8x16xf32>
    %cst_7 = arith.constant dense<0.000000e+00> : vector<8xf32>
    %28 = vector.multi_reduction <add>, %27, %cst_7 [1] : vector<8x16xf32> to vector<8xf32>
    %29 = vector.shape_cast %28 : vector<8xf32> to vector<8x1xf32>
    %30 = arith.subf %25, %29 : vector<8x1xf32>
    %c0_8 = arith.constant 0 : index
    %c0_9 = arith.constant 0 : index
    %31 = vector.load %arg5[%c0_8, %c0_9] : memref<1x16xf32, #tpu.memory_space<vmem>>, vector<1x16xf32>
    %32 = arith.extui %16 : vector<8x16xi1> to vector<8x16xi32>
    %33 = arith.sitofp %32 : vector<8x16xi32> to vector<8x16xf32>
    %cst_10 = arith.constant dense<0.000000e+00> : vector<16xf32>
    %34 = vector.multi_reduction <add>, %33, %cst_10 [0] : vector<8x16xf32> to vector<16xf32>
    %35 = vector.shape_cast %34 : vector<16xf32> to vector<1x16xf32>
    %36 = arith.addf %31, %35 : vector<1x16xf32>
    %c0_11 = arith.constant 0 : index
    %c0_12 = arith.constant 0 : index
    %37 = vector.load %arg5[%c0_11, %c0_12] : memref<1x16xf32, #tpu.memory_space<vmem>>, vector<1x16xf32>
    tpu.vector_store %arg5[%c0_11, %c0_12], %36 {strides = array<i32>} : memref<1x16xf32, #tpu.memory_space<vmem>>, vector<1x16xf32>,
    %c0_13 = arith.constant 0 : index
    %c0_14 = arith.constant 0 : index
    %38 = vector.load %arg6[%c0_13, %c0_14] : memref<1x16xf32, #tpu.memory_space<vmem>>, vector<1x16xf32>
    %cst_15 = arith.constant 0.000000e+00 : f32
    %39 = vector.shape_cast %30 : vector<8x1xf32> to vector<8x1xf32>
    %40 = vector.broadcast %39 : vector<8x1xf32> to vector<8x16xf32>
    %41 = vector.broadcast %cst_15 : f32 to vector<8x16xf32>
    %42 = arith.select %16, %40, %41 : vector<8x16xi1>, vector<8x16xf32>
    %cst_16 = arith.constant dense<0.000000e+00> : vector<16xf32>
    %43 = vector.multi_reduction <add>, %42, %cst_16 [0] : vector<8x16xf32> to vector<16xf32>
    %44 = vector.shape_cast %43 : vector<16xf32> to vector<1x16xf32>
    %45 = arith.addf %38, %44 : vector<1x16xf32>
    %c0_17 = arith.constant 0 : index
    %c0_18 = arith.constant 0 : index
    %46 = vector.load %arg6[%c0_17, %c0_18] : memref<1x16xf32, #tpu.memory_space<vmem>>, vector<1x16xf32>
    tpu.vector_store %arg6[%c0_17, %c0_18], %45 {strides = array<i32>} : memref<1x16xf32, #tpu.memory_space<vmem>>, vector<1x16xf32>,
    %c0_19 = arith.constant 0 : index
    %c0_20 = arith.constant 0 : index
    %47 = vector.load %arg7[%c0_19, %c0_20] : memref<1x1xf32, #tpu.memory_space<vmem>>, vector<1x1xf32>
    %cst_21 = arith.constant 0.000000e+00 : f32
    %48 = vector.broadcast %cst_21 : f32 to vector<8x1xf32>
    %49 = arith.select %11, %30, %48 : vector<8x1xi1>, vector<8x1xf32>
    %cst_22 = arith.constant dense<0.000000e+00> : vector<1xf32>
    %50 = vector.multi_reduction <add>, %49, %cst_22 [0] : vector<8x1xf32> to vector<1xf32>
    %51 = vector.shape_cast %50 : vector<1xf32> to vector<1x1xf32>
    %52 = arith.addf %47, %51 : vector<1x1xf32>
    %c0_23 = arith.constant 0 : index
    %c0_24 = arith.constant 0 : index
    %53 = vector.load %arg7[%c0_23, %c0_24] : memref<1x1xf32, #tpu.memory_space<vmem>>, vector<1x1xf32>
    tpu.vector_store %arg7[%c0_23, %c0_24], %52 {strides = array<i32>} : memref<1x1xf32, #tpu.memory_space<vmem>>, vector<1x1xf32>,
    %c0_i32_25 = arith.constant 0 : i32
    %54 = arith.cmpi eq, %arg0, %c0_i32_25 : i32
    %55 = arith.extui %54 : i1 to i32
    %c0_i32_26 = arith.constant 0 : i32
    %56 = arith.cmpi ne, %55, %c0_i32_26 : i32
    scf.if %56 {
      %c0_27 = arith.constant 0 : index
      %c0_28 = arith.constant 0 : index
      %57 = vector.load %arg1[%c0_27, %c0_28] : memref<1x1xf32, #tpu.memory_space<vmem>>, vector<1x1xf32>
      %c0_29 = arith.constant 0 : index
      %c0_30 = arith.constant 0 : index
      %58 = vector.load %arg5[%c0_29, %c0_30] : memref<1x16xf32, #tpu.memory_space<vmem>>, vector<1x16xf32>
      %cst_31 = arith.constant 0.000000e+00 : f32
      %59 = vector.broadcast %cst_31 : f32 to vector<1x16xf32>
      %60 = arith.cmpf ogt, %58, %59 : vector<1x16xf32>
      %c0_32 = arith.constant 0 : index
      %c0_33 = arith.constant 0 : index
      %61 = vector.load %arg6[%c0_32, %c0_33] : memref<1x16xf32, #tpu.memory_space<vmem>>, vector<1x16xf32>
      %cst_34 = arith.constant 1.000000e+00 : f32
      %62 = vector.broadcast %cst_34 : f32 to vector<1x16xf32>
      %63 = arith.select %60, %58, %62 : vector<1x16xi1>, vector<1x16xf32>
      %64 = arith.divf %61, %63 : vector<1x16xf32>
      %cst_35 = arith.constant 0.000000e+00 : f32
      %65 = vector.broadcast %cst_35 : f32 to vector<1x16xf32>
      %66 = arith.select %60, %64, %65 : vector<1x16xi1>, vector<1x16xf32>
      %67 = arith.extui %60 : vector<1x16xi1> to vector<1x16xi32>
      %68 = arith.sitofp %67 : vector<1x16xi32> to vector<1x16xf32>
      %cst_36 = arith.constant dense<0.000000e+00> : vector<1xf32>
      %69 = vector.multi_reduction <add>, %68, %cst_36 [1] : vector<1x16xf32> to vector<1xf32>
      %70 = vector.shape_cast %69 : vector<1xf32> to vector<1x1xf32>
      %cst_37 = arith.constant dense<0.000000e+00> : vector<1xf32>
      %71 = vector.multi_reduction <add>, %66, %cst_37 [1] : vector<1x16xf32> to vector<1xf32>
      %72 = vector.shape_cast %71 : vector<1xf32> to vector<1x1xf32>
      %73 = arith.divf %72, %70 : vector<1x1xf32>
      %c0_38 = arith.constant 0 : index
      %c0_39 = arith.constant 0 : index
      %74 = vector.load %arg7[%c0_38, %c0_39] : memref<1x1xf32, #tpu.memory_space<vmem>>, vector<1x1xf32>
      %cst_40 = arith.constant 8.000000e+00 : f32
      %75 = vector.broadcast %cst_40 : f32 to vector<1x1xf32>
      %76 = arith.divf %74, %75 : vector<1x1xf32>
      %cst_41 = arith.constant 1.000000e+00 : f32
      %77 = vector.broadcast %cst_41 : f32 to vector<1x1xf32>
      %78 = arith.subf %77, %57 : vector<1x1xf32>
      %79 = arith.mulf %78, %76 : vector<1x1xf32>
      %80 = arith.mulf %57, %73 : vector<1x1xf32>
      %81 = arith.addf %79, %80 : vector<1x1xf32>
      %c0_42 = arith.constant 0 : index
      %c0_43 = arith.constant 0 : index
      %82 = vector.load %arg4[%c0_42, %c0_43] : memref<1x1xf32, #tpu.memory_space<vmem>>, vector<1x1xf32>
      tpu.vector_store %arg4[%c0_42, %c0_43], %81 {strides = array<i32>} : memref<1x1xf32, #tpu.memory_space<vmem>>, vector<1x1xf32>,
    } else {
    }
    return
  }
  func.func @transform_0(%arg0: i32) -> (i32, i32) {
    %c0_i32 = arith.constant 0 : i32
    %c0_i32_0 = arith.constant 0 : i32
    %c0_i32_1 = arith.constant 0 : i32
    return %c0_i32, %c0_i32_0 : i32, i32
  }
  func.func @transform_1(%arg0: i32) -> (i32, i32) {
    %c0_i32 = arith.constant 0 : i32
    %c0_i32_0 = arith.constant 0 : i32
    return %arg0, %c0_i32 : i32, i32
  }
  func.func @transform_2(%arg0: i32) -> (i32, i32) {
    %c0_i32 = arith.constant 0 : i32
    %c0_i32_0 = arith.constant 0 : i32
    return %arg0, %c0_i32 : i32, i32
  }
  func.func @transform_3(%arg0: i32) -> (i32, i32) {
    %c0_i32 = arith.constant 0 : i32
    %c0_i32_0 = arith.constant 0 : i32
    %c0_i32_1 = arith.constant 0 : i32
    return %c0_i32, %c0_i32_0 : i32, i32
  }
}

</mosaic_0001>

<bundles_post_ra>
// kernel: tpu_custom_call.1
= control target key start
LH: loop header
LB: loop body
LE: loop exit
PB: predicated region body
PF: predicated region fallthrough
CT: control target
= control target key end

     0   :  { %s340_s0 = inlined_call_operand.<no memory space> [shape: f32[1,1], index: 0, kind: input, shape index: {}]   ;;  %s341_s1 = inlined_call_operand.hbm [shape: bf16[8,16], index: 1, kind: input, shape index: {}]   ;;  %s342_s2 = inlined_call_operand.hbm [shape: s32[8,1], index: 2, kind: input, shape index: {}]   ;;  %s343_s3 = inlined_call_operand.hbm [shape: f32[1,1], index: 3, kind: output, shape index: {}]  }
   0x1   :  { %v8_v0 = vstv %s340_s0 }
   0x2   :  { %9 = vst [vmem:[#allocation5] sm:$0x1] %v8_v0 }
   0x3   :  { %10 = vsyncpa [#allocation7], 0 }
   0x4   :  { %11 = vsyncpa [#allocation10], 0 }
   0x5   :  { %12 = vsyncpa [#allocation8], 0  ;;  %s255_s14 = smov [#allocation6]   ;;  %s256_s16 = smov [#allocation9]  }
   0x6   :  { %s21_s15 = sshll.u32 %s255_s14, 4  ;;  %s31_s17 = sshll.u32 %s256_s16, 4  ;;  %s22_s15 = int_to_ptr.vmem [resolvable:$true] %s21_s15  ;;  %s32_s17 = int_to_ptr.vmem [resolvable:$true] %s31_s17 }
   0x7   :  { %s183_s20 = scalar_lea.hbm %s341_s1, 64 }
   0x8   :  { %p184_p0 = scmp.ne.s32.totalorder %s341_s1, %s183_s20  ;;  %p187_p1 = scmp.lt.u32.totalorder %s183_s20, %s341_s1 }
   0xa   :  { %p189_p2 = pnand %p187_p1, %p184_p0 }
   0xc   :  { %192 = shalt.err (!%p189_p2)
}
   0xd   :  { %s193_s24 = scalar_lea.vmem %s22_s15, 64  ;;  %p198_p4 = scmp.lt.s32.totalorder %s22_s15, %s22_s15 }
   0xe   :  { %p194_p3 = scmp.ne.s32.totalorder %s22_s15, %s193_s24  ;;  %p199_p5 = scmp.lt.s32.totalorder %s193_s24, %s193_s24 }
  0x10   :  { %p200_p6 = por %p199_p5, %p198_p4 }
  0x12   :  { %p201_p7 = pnand %p200_p6, %p194_p3 }
  0x14   :  { %204 = shalt.err (!%p201_p7)
}
  0x15   :  { %24 = dma.hbm_to_vmem [thread:$0]  %s341_s1, 64, %s22_s15, [#allocation7]  }
  0x16   :  { %s205_s29 = scalar_lea.hbm %s342_s2, 128 }
  0x17   :  { %p206_p8 = scmp.ne.s32.totalorder %s342_s2, %s205_s29  ;;  %p209_p9 = scmp.lt.u32.totalorder %s205_s29, %s342_s2 }
  0x19   :  { %p211_p10 = pnand %p209_p9, %p206_p8 }
  0x1b   :  { %214 = shalt.err (!%p211_p10)
}
  0x1c   :  { %s215_s7 = scalar_lea.vmem %s32_s17, 128  ;;  %p220_p12 = scmp.lt.s32.totalorder %s32_s17, %s32_s17 }
  0x1d   :  { %p216_p11 = scmp.ne.s32.totalorder %s32_s17, %s215_s7  ;;  %p221_p13 = scmp.lt.s32.totalorder %s215_s7, %s215_s7 }
  0x1f   :  { %p222_p0 = por %p221_p13, %p220_p12 }
  0x21   :  { %p223_p1 = pnand %p222_p0, %p216_p11 }
  0x23   :  { %226 = shalt.err (!%p223_p1)
}
  0x24   :  { %34 = dma.hbm_to_vmem [thread:$0]  %s342_s2, 128, %s32_s17, [#allocation10]  }
  0x25   :  { %249 = dma.done.wait [#allocation7], 64  }
  0x26   :  { %250 = vsyncadd [#allocation7], 4294967232 }
  0x27   :  { %251 = dma.done.wait [#allocation10], 128  }
  0x28   :  { %252 = vsyncadd [#allocation10], 4294967168  ;;  %v257_v1 = vmov 0   ;;  %v51_v2 = vld [vmem:[#allocation6] sm:$0xf]  ;;  %vm69_vm0 = vcmask 130048   ;;  %v60_v9 = vlaneseq }
  0x29   :  { %174 = vset.pattern.permute.xlu0 %v257_v1  ;;  %v52_v3 = vunpack.c.l.bf16 %v51_v2  ;;  %v53_v5 = vld [vmem:[#allocation9] sm:$0xff]  ;;  %vm45_vm1 = vcmask 122880   ;;  %v258_v6 = vmov 0.0   ;;  %vm48_vm4 = vcmask 0   ;;  %v125_v61 = vld [vmem:[#allocation5] sm:$0x1] }
  0x2a   :  { %46 = vst.msk [vmem:[#allocation2] sm:$0x1] %vm45_vm1, %v258_v6  ;;  %47 = vst.msk [vmem:[#allocation3] sm:$0x1] %vm45_vm1, %v258_v6  ;;  %v61_v11 = vand.u32 127, %v60_v9  ;;  %v146_v0 = vsub.f32 1.0, %v125_v61 }
  0x2b   :  { %v70_v4 = vsel %vm69_vm0, %v52_v3, -inf  ;;  %49 = vst.msk [vmem:[#allocation4] sm:$0x1] %vm48_vm4, %v258_v6  ;;  %50 = vst.msk [vmem:[#allocation11] sm:$0x1] %vm48_vm4, %v258_v6  ;;  %s259_s2 = smov [#allocation11]  }
  0x2c   :  { %71 = vmax.xlane.f32.xlu0 %v70_v4  ;;  %s157_s9 = sshll.u32 %s259_s2, 4  ;;  %s158_s9 = int_to_ptr.vmem [resolvable:$true] %s157_s9 }
  0x2d   :  { %s227_s10 = scalar_lea.vmem %s158_s9, 16  ;;  %s231_s11 = scalar_lea.vmem %s158_s9, 32 }
  0x2e   :  { %p228_p2 = scmp.ne.s32.totalorder %s158_s9, %s227_s10  ;;  %p232_p3 = scmp.lt.s32.totalorder %s158_s9, %s158_s9 }
  0x2f   :  { %p233_p4 = scmp.lt.s32.totalorder %s231_s11, %s227_s10 }
  0x31   :  { %v87_v24 = vld [vmem:[#allocation2] sm:$0x1]  ;;  %v100_v51 = vld [vmem:[#allocation3] sm:$0x1]  ;;  %p234_p5 = por %p233_p4, %p232_p3 }
  0x32   :  { %v111_v47 = vld [vmem:[#allocation4] sm:$0x1] }
  0x33   :  { %p235_p6 = pnand %p234_p5, %p228_p2 }
  0x42   :  { %63 = vperm.xlu0 %174, %v53_v5  }
  0xb9   :  { %v72_v7 = vpop.xlane.xlu0 %71 }
  0xba   :  { %v73_v8 = vsub.f32 %v52_v3, %v72_v7 }
  0xbc   :  { %v74_v10 = vmul.f32 1.442695, %v73_v8 }
  0xbe   :  { %175 = vpow2.f32 %v74_v10 }
  0xc1   :  { %v64_v12 = vpop.permute.xlu0 %63 }
  0xc2   :  { %vm65_vm2 = vcmp.eq.s32.totalorder %v61_v11, %v64_v12 }
  0xc3   :  { %v167_v13 = vsel %vm65_vm2, 1.0, %v258_v6  ;;  %v82_v18 = vsel %vm65_vm2, %v52_v3, 0.0 }
  0xc4   :  { %v90_v14 = vsel %vm69_vm0, %v167_v13, 0.0  ;;  %v83_v22 = vsel %vm69_vm0, %v82_v18, 0.0 }
  0xc5   :  { %v91_v15 = vrot.slane %v90_v14, 4 }
  0xc7   :  { %v92_v16 = vadd.f32 %v91_v15, %v90_v14 }
  0xc8   :  { %v176_v17 = vpop.eup %175 }
  0xc9   :  { %v76_v19 = vsel %vm69_vm0, %v176_v17, 0.0  ;;  %v93_v20 = vrot.slane %v92_v16, 2 }
  0xca   :  { %77 = vadd.xlane.f32.xlu1 %v76_v19 }
  0xcb   :  { %v94_v21 = vadd.f32 %v93_v20, %v92_v16 }
  0xcd   :  { %v95_v23 = vrot.slane %v94_v21, 1 }
  0xce   :  { %84 = vadd.xlane.f32.xlu1 %v83_v22 }
  0xcf   :  { %v96_v25 = vadd.f32 %v95_v23, %v94_v21 }
  0xd1   :  { %v97_v26 = vadd.f32 %v96_v25, %v87_v24 }
  0xd3   :  { %99 = vst.msk [vmem:[#allocation2] sm:$0x1] %vm45_vm1, %v97_v26 }
  0xda   :  { %v126_v27 = vld [vmem:[#allocation2] sm:$0x1] }
  0xdb   :  { %vm127_vm3 = vcmp.gt.f32.partialorder %v126_v27, 0.0 }
  0xdc   :  { %v168_v28 = vsel %vm127_vm3, 1.0, %v258_v6  ;;  %v129_v48 = vsel %vm127_vm3, %v126_v27, 1.0 }
  0xdd   :  { %v135_v29 = vsel %vm45_vm1, %v168_v28, 0.0 }
  0xde   :  { %136 = vadd.xlane.f32.xlu1 %v135_v29 }
 0x157   :  { %v78_v30 = vpop.xlane.xlu1 %77 }
 0x158   :  { %177 = vlog2.f32 %v78_v30 }
 0x159   :  { %179 = vrcp.f32 %v129_v48 }
 0x15b   :  { %v85_v33 = vpop.xlane.xlu1 %84 }
 0x162   :  { %v178_v31 = vpop.eup %177 }
 0x163   :  { %v80_v32 = vmul.f32 0.6931472, %v178_v31  ;;  %v180_v55 = vpop.eup %179 }
 0x165   :  { %v81_v34 = vadd.f32 %v80_v32, %v72_v7 }
 0x167   :  { %v86_v35 = vsub.f32 %v81_v34, %v85_v33 }
 0x169   :  { %v101_v36 = vsel %vm65_vm2, %v86_v35, 0.0  ;;  %v113_v37 = vrot.slane %v86_v35, 4 }
 0x16a   :  { %v102_v38 = vsel %vm69_vm0, %v101_v36, 0.0 }
 0x16b   :  { %v103_v39 = vrot.slane %v102_v38, 4  ;;  %v114_v40 = vadd.f32 %v113_v37, %v86_v35  ;;  %v137_v60 = vpop.xlane.xlu1 %136 }
 0x16c   :  { %181 = vrcp.f32 %v137_v60 }
 0x16d   :  { %v104_v41 = vadd.f32 %v103_v39, %v102_v38  ;;  %v115_v42 = vrot.slane %v114_v40, 2 }
 0x16f   :  { %v105_v43 = vrot.slane %v104_v41, 2  ;;  %v116_v44 = vadd.f32 %v115_v42, %v114_v40 }
 0x171   :  { %v106_v45 = vadd.f32 %v105_v43, %v104_v41  ;;  %v117_v46 = vrot.slane %v116_v44, 1 }
 0x173   :  { %v107_v49 = vrot.slane %v106_v45, 1  ;;  %v118_v50 = vadd.f32 %v117_v46, %v116_v44 }
 0x175   :  { %v108_v52 = vadd.f32 %v107_v49, %v106_v45  ;;  %v119_v53 = vadd.f32 %v118_v50, %v111_v47 }
 0x176   :  { %v182_v1 = vpop.eup %181 }
 0x177   :  { %v109_v54 = vadd.f32 %v108_v52, %v100_v51  ;;  %121 = vst.msk [vmem:[#allocation4] sm:$0x1] %vm48_vm4, %v119_v53 }
 0x179   :  { %110 = vst.msk [vmem:[#allocation3] sm:$0x1] %vm45_vm1, %v109_v54 }
 0x17e   :  { %v143_v62 = vld [vmem:[#allocation4] sm:$0x1] }
 0x17f   :  { %v145_v63 = vmul.f32 0.125, %v143_v62 }
 0x180   :  { %v128_v56 = vld [vmem:[#allocation3] sm:$0x1] }
 0x181   :  { %v131_v57 = vmul.f32 %v180_v55, %v128_v56  ;;  %v147_v4 = vmul.f32 %v146_v0, %v145_v63 }
 0x183   :  { %v132_v58 = vsel %vm127_vm3, %v131_v57, 0.0 }
 0x184   :  { %v138_v59 = vsel %vm45_vm1, %v132_v58, 0.0 }
 0x185   :  { %139 = vadd.xlane.f32.xlu1 %v138_v59 }
 0x212   :  { %v140_v2 = vpop.xlane.xlu1 %139 }
 0x213   :  { %v142_v3 = vmul.f32 %v182_v1, %v140_v2 }
 0x215   :  { %v148_v5 = vmul.f32 %v142_v3, %v125_v61 }
 0x217   :  { %v149_v6 = vadd.f32 %v148_v5, %v147_v4 }
 0x219   :  { %150 = vst.msk [vmem:[#allocation11] sm:$0x1] %vm48_vm4, %v149_v6 }
 0x21a   :  { %238 = shalt.err (!%p235_p6)
}
 0x21b   :  { %s239_s14 = scalar_lea.hbm %s343_s3, 16 }
 0x21c   :  { %p240_p7 = scmp.ne.s32.totalorder %s343_s3, %s239_s14  ;;  %p243_p8 = scmp.lt.u32.totalorder %s239_s14, %s343_s3 }
 0x21e   :  { %p245_p9 = pnand %p243_p8, %p240_p7 }
 0x220   :  { %248 = shalt.err (!%p245_p9)
}
 0x221   :  { %160 = dma.vmem_to_hbm [thread:$0]  %s158_s9, 16, %s343_s3, [#allocation8]  }
 0x222   :  { %253 = dma.done.wait [#allocation8], 16  }
 0x223   :  { %254 = vsyncadd [#allocation8], 4294967280 }
 0x224   :  { %164 = vsyncpa [#allocation7], 1 }
 0x225   :  { %165 = vsyncpa [#allocation10], 1 }
 0x226   :  { %166 = vsyncpa [#allocation8], 1 }

</bundles_post_ra>
